<compile_context>
chip_gen: v6e
topology: v6e:2x2x1
jax: 0.10.0
libtpu: 0.0.40
codegen_flags: <defaults>
</compile_context>

<pallas_src>
import functools

import jax
import jax.numpy as jnp
import numpy as np
from jax.experimental import pallas as pl
from jax.experimental.pallas import tpu as pltpu


# ----------------------------- Pallas kernel ------------------------------- #
def lstm_kernel(x_ref, wih_ref, whh_ref, b_ref, wlin_ref, blin_ref,
                out_ref, hn_ref, gates_ref, *, seq_len):
    """x_ref: (T*Bp, E) time-major, batch-padded embedded inputs.

    Computes h_T of a single-layer LSTM (zero initial state) and
    sigmoid(linear(h_T)).  Whole thing runs in one grid step.
    """
    T = seq_len
    Bp = x_ref.shape[0] // T
    H = whh_ref.shape[0]

    # --- hoisted input projection: ONE MXU matmul for all T timesteps, bias folded in.
    #     Staged in VMEM scratch so the loop below reads one (Bp, 4H) tile per step.
    gates_ref[...] = (jnp.dot(x_ref[...], wih_ref[...],
                              preferred_element_type=jnp.float32)
                      + b_ref[...])                              # (T*Bp, 4H)

    whh = whh_ref[...]                                           # (H, 4H), resident
    h = jnp.zeros((Bp, H), jnp.float32)
    c = jnp.zeros((Bp, H), jnp.float32)

    # --- recurrence: only the hidden projection + gate math is on the serial chain.
    for t in range(T):                                           # static unroll (T small)
        g = gates_ref[t * Bp:(t + 1) * Bp, :] + jnp.dot(
            h, whh, preferred_element_type=jnp.float32)          # (Bp, 4H)

        # One full-vreg sigmoid (covers i, f, o lanes) + one tanh on the g column:
        # 2 EUP issues per step; the slices are cheap static lane selects.
        sg = jax.nn.sigmoid(g)
        i_g = sg[:, 0 * H:1 * H]
        f_g = sg[:, 1 * H:2 * H]
        g_g = jnp.tanh(g[:, 2 * H:3 * H])
        o_g = sg[:, 3 * H:4 * H]

        c = f_g * c + i_g * g_g
        h = o_g * jnp.tanh(c)

    # --- finalize: each output written exactly once.
    hn_ref[...] = h
    out_ref[...] = jax.nn.sigmoid(
        jnp.dot(h, wlin_ref[...], preferred_element_type=jnp.float32)
        + blin_ref[...])


def embedding_lstm_forward(tokens, params):
    """tokens: (B, T) int32. Returns (sigmoid(linear(h_T)), h_T) like the PyTorch module."""
    emb_w = params["embedding"]                      # (V, E)
    w_ih_t = params["w_ih_t"]                        # (E, 4H)
    w_hh_t = params["w_hh_t"]                        # (H, 4H)
    b = params["b"]                                  # (1, 4H)  (b_ih + b_hh)
    w_lin_t = params["w_lin_t"]                      # (H, 3)
    b_lin = params["b_lin"]                          # (1, 3)

    B, T = tokens.shape
    E = emb_w.shape[1]
    H = w_hh_t.shape[0]

    # Embedding gather directly in time-major order (glue; avoids a (B,T,E) transpose).
    x_emb = jnp.take(emb_w, tokens.T, axis=0)        # (T, B, E)

    # Pad batch up to the 8-row f32 sublane minimum (padded rows are independent junk).
    Bp = max(8, ((B + 7) // 8) * 8)
    if Bp != B:
        x_emb = jnp.pad(x_emb, ((0, 0), (0, Bp - B), (0, 0)))
    x_flat = x_emb.reshape(T * Bp, E)                # (T*Bp, E), time-major blocks of Bp

    kernel = functools.partial(lstm_kernel, seq_len=T)

    out_p, hn_p = pl.pallas_call(
        kernel,
        out_shape=(jax.ShapeDtypeStruct((Bp, 3), jnp.float32),
                   jax.ShapeDtypeStruct((Bp, H), jnp.float32)),
        grid_spec=pltpu.PrefetchScalarGridSpec(
            num_scalar_prefetch=0,
            grid=(1,),                               # single invocation; loop is in-kernel
            in_specs=[
                pl.BlockSpec((T * Bp, E), lambda i: (0, 0)),    # all timesteps at once
                pl.BlockSpec((E, 4 * H), lambda i: (0, 0)),     # W_ih^T
                pl.BlockSpec((H, 4 * H), lambda i: (0, 0)),     # W_hh^T
                pl.BlockSpec((1, 4 * H), lambda i: (0, 0)),     # b_ih + b_hh
                pl.BlockSpec((H, 3), lambda i: (0, 0)),         # linear W^T
                pl.BlockSpec((1, 3), lambda i: (0, 0)),         # linear bias
            ],
            out_specs=[
                pl.BlockSpec((Bp, 3), lambda i: (0, 0)),
                pl.BlockSpec((Bp, H), lambda i: (0, 0)),
            ],
            scratch_shapes=[
                pltpu.VMEM((T * Bp, 4 * H), jnp.float32),       # staged gate pre-acts
            ],
        ),
        compiler_params=pltpu.CompilerParams(
            dimension_semantics=("arbitrary",)),
    )(x_flat, w_ih_t, w_hh_t, b, w_lin_t, b_lin)

    return out_p[:B], hn_p[:B]


# ------------------------- pure-JAX reference ------------------------------ #
def reference_forward(tokens, params):
    emb_w = params["embedding"]
    x_emb = jnp.take(emb_w, tokens, axis=0)          # (B, T, E)
    B, T, E = x_emb.shape
    H = params["w_hh_t"].shape[0]
    h = jnp.zeros((B, H), jnp.float32)
    c = jnp.zeros((B, H), jnp.float32)
    for t in range(T):
        gates = x_emb[:, t] @ params["w_ih_t"] + h @ params["w_hh_t"] + params["b"]
        i = jax.nn.sigmoid(gates[:, 0 * H:1 * H])
        f = jax.nn.sigmoid(gates[:, 1 * H:2 * H])
        g = jnp.tanh(gates[:, 2 * H:3 * H])
        o = jax.nn.sigmoid(gates[:, 3 * H:4 * H])
        c = f * c + i * g
        h = o * jnp.tanh(c)
    out = jax.nn.sigmoid(h @ params["w_lin_t"] + params["b_lin"])
    return out, h


# --------------------------------- main ------------------------------------ #
if __name__ == "__main__":
    VOCAB, EMB, HID = 20, 16, 32
    B, T = 2, 8

    key = jax.random.PRNGKey(0)
    keys = jax.random.split(key, 8)
    k = 1.0 / np.sqrt(HID)
    params = {
        "embedding": jax.random.normal(keys[0], (VOCAB, EMB), jnp.float32),
        # PyTorch LSTM weights are (4H, E)/(4H, H); we pre-transpose for x @ W^T.
        "w_ih_t": jax.random.uniform(keys[1], (EMB, 4 * HID), jnp.float32, -k, k),
        "w_hh_t": jax.random.uniform(keys[2], (HID, 4 * HID), jnp.float32, -k, k),
        "b": (jax.random.uniform(keys[3], (1, 4 * HID), jnp.float32, -k, k)
              + jax.random.uniform(keys[4], (1, 4 * HID), jnp.float32, -k, k)),
        "w_lin_t": jax.random.uniform(keys[5], (HID, 3), jnp.float32, -k, k),
        "b_lin": jax.random.uniform(keys[6], (1, 3), jnp.float32, -k, k),
    }
    tokens = jax.random.randint(keys[7], (B, T), 0, VOCAB, dtype=jnp.int32)

    out, h_n = embedding_lstm_forward(tokens, params)
    out, h_n = jax.block_until_ready(out), jax.block_until_ready(h_n)

    ref_out, ref_h = reference_forward(tokens, params)
    assert np.allclose(np.asarray(out), np.asarray(ref_out), rtol=1e-3, atol=1e-3)
    assert np.allclose(np.asarray(h_n), np.asarray(ref_h), rtol=1e-3, atol=1e-3)

    print("KERNEL_OK")
</pallas_src>

<mosaic_0001>
module attributes {stable_mosaic.version = 11 : i64} {
  func.func @lstm_kernel(%arg0: i32, %arg1: memref<64x16xf32, #tpu.memory_space<vmem>>, %arg2: memref<16x128xf32, #tpu.memory_space<vmem>>, %arg3: memref<32x128xf32, #tpu.memory_space<vmem>>, %arg4: memref<1x128xf32, #tpu.memory_space<vmem>>, %arg5: memref<32x3xf32, #tpu.memory_space<vmem>>, %arg6: memref<1x3xf32, #tpu.memory_space<vmem>>, %arg7: memref<8x3xf32, #tpu.memory_space<vmem>>, %arg8: memref<8x32xf32, #tpu.memory_space<vmem>>, %arg9: memref<64x128xf32, #tpu.memory_space<vmem>>) attributes {dimension_semantics = [#tpu.dimension_semantics<arbitrary>], iteration_bounds = array<i64: 1>, scalar_prefetch = 0 : i64, scratch_operands = 1 : i64, tpu.core_type = #tpu.core_type<tc>, window_params = [{pipeline_mode = #tpu.pipeline_mode<synchronous>, transform_indices = @transform_0, window_bounds = array<i64: 64, 16>}, {pipeline_mode = #tpu.pipeline_mode<synchronous>, transform_indices = @transform_1, window_bounds = array<i64: 16, 128>}, {pipeline_mode = #tpu.pipeline_mode<synchronous>, transform_indices = @transform_2, window_bounds = array<i64: 32, 128>}, {pipeline_mode = #tpu.pipeline_mode<synchronous>, transform_indices = @transform_3, window_bounds = array<i64: 1, 128>}, {pipeline_mode = #tpu.pipeline_mode<synchronous>, transform_indices = @transform_4, window_bounds = array<i64: 32, 3>}, {pipeline_mode = #tpu.pipeline_mode<synchronous>, transform_indices = @transform_5, window_bounds = array<i64: 1, 3>}, {pipeline_mode = #tpu.pipeline_mode<synchronous>, transform_indices = @transform_6, window_bounds = array<i64: 8, 3>}, {pipeline_mode = #tpu.pipeline_mode<synchronous>, transform_indices = @transform_7, window_bounds = array<i64: 8, 32>}]} {
    %c0 = arith.constant 0 : index
    %c0_0 = arith.constant 0 : index
    %0 = vector.load %arg1[%c0, %c0_0] : memref<64x16xf32, #tpu.memory_space<vmem>>, vector<64x16xf32>
    %c0_1 = arith.constant 0 : index
    %c0_2 = arith.constant 0 : index
    %1 = vector.load %arg2[%c0_1, %c0_2] : memref<16x128xf32, #tpu.memory_space<vmem>>, vector<16x128xf32>
    %cst = arith.constant dense<0.000000e+00> : vector<64x128xf32>
    %2 = tpu.matmul %0, %1, %cst {dimension_numbers = #tpu.dot_dimension_numbers<[1], [0], [0], [1], [0, 0, 1, 1], [], []>} : vector<64x16xf32>, vector<16x128xf32>, vector<64x128xf32> -> vector<64x128xf32>
    %c0_3 = arith.constant 0 : index
    %c0_4 = arith.constant 0 : index
    %3 = vector.load %arg4[%c0_3, %c0_4] : memref<1x128xf32, #tpu.memory_space<vmem>>, vector<1x128xf32>
    %4 = vector.broadcast %3 : vector<1x128xf32> to vector<64x128xf32>
    %5 = arith.addf %2, %4 : vector<64x128xf32>
    %c0_5 = arith.constant 0 : index
    %c0_6 = arith.constant 0 : index
    %6 = vector.load %arg9[%c0_5, %c0_6] : memref<64x128xf32, #tpu.memory_space<vmem>>, vector<64x128xf32>
    tpu.vector_store %arg9[%c0_5, %c0_6], %5 {strides = array<i32>} : memref<64x128xf32, #tpu.memory_space<vmem>>, vector<64x128xf32>,
    %c0_7 = arith.constant 0 : index
    %c0_8 = arith.constant 0 : index
    %7 = vector.load %arg3[%c0_7, %c0_8] : memref<32x128xf32, #tpu.memory_space<vmem>>, vector<32x128xf32>
    %cst_9 = arith.constant 0.000000e+00 : f32
    %8 = vector.broadcast %cst_9 : f32 to vector<8x32xf32>
    %cst_10 = arith.constant 0.000000e+00 : f32
    %9 = vector.broadcast %cst_10 : f32 to vector<8x32xf32>
    %c0_11 = arith.constant 0 : index
    %c0_12 = arith.constant 0 : index
    %10 = vector.load %arg9[%c0_11, %c0_12] : memref<64x128xf32, #tpu.memory_space<vmem>>, vector<8x128xf32>
    %cst_13 = arith.constant dense<0.000000e+00> : vector<8x128xf32>
    %11 = tpu.matmul %8, %7, %cst_13 {dimension_numbers = #tpu.dot_dimension_numbers<[1], [0], [0], [1], [0, 0, 1, 1], [], []>} : vector<8x32xf32>, vector<32x128xf32>, vector<8x128xf32> -> vector<8x128xf32>
    %12 = arith.addf %10, %11 : vector<8x128xf32>
    %13 = arith.negf %12 : vector<8x128xf32>
    %14 = math.exp %13 : vector<8x128xf32>
    %cst_14 = arith.constant 1.000000e+00 : f32
    %15 = vector.broadcast %cst_14 : f32 to vector<8x128xf32>
    %16 = arith.addf %15, %14 : vector<8x128xf32>
    %17 = arith.divf %15, %16 : vector<8x128xf32>
    %18 = vector.extract_strided_slice %17 {offsets = [0, 0], sizes = [8, 32], strides = [1, 1]} : vector<8x128xf32> to vector<8x32xf32>
    %19 = vector.extract_strided_slice %17 {offsets = [0, 32], sizes = [8, 32], strides = [1, 1]} : vector<8x128xf32> to vector<8x32xf32>
    %20 = vector.extract_strided_slice %12 {offsets = [0, 64], sizes = [8, 32], strides = [1, 1]} : vector<8x128xf32> to vector<8x32xf32>
    %21 = math.tanh %20 : vector<8x32xf32>
    %22 = vector.extract_strided_slice %17 {offsets = [0, 96], sizes = [8, 32], strides = [1, 1]} : vector<8x128xf32> to vector<8x32xf32>
    %23 = arith.mulf %19, %9 : vector<8x32xf32>
    %24 = arith.mulf %18, %21 : vector<8x32xf32>
    %25 = arith.addf %23, %24 : vector<8x32xf32>
    %26 = math.tanh %25 : vector<8x32xf32>
    %27 = arith.mulf %22, %26 : vector<8x32xf32>
    %c8 = arith.constant 8 : index
    %c0_15 = arith.constant 0 : index
    %28 = vector.load %arg9[%c8, %c0_15] : memref<64x128xf32, #tpu.memory_space<vmem>>, vector<8x128xf32>
    %cst_16 = arith.constant dense<0.000000e+00> : vector<8x128xf32>
    %29 = tpu.matmul %27, %7, %cst_16 {dimension_numbers = #tpu.dot_dimension_numbers<[1], [0], [0], [1], [0, 0, 1, 1], [], []>} : vector<8x32xf32>, vector<32x128xf32>, vector<8x128xf32> -> vector<8x128xf32>
    %30 = arith.addf %28, %29 : vector<8x128xf32>
    %31 = arith.negf %30 : vector<8x128xf32>
    %32 = math.exp %31 : vector<8x128xf32>
    %cst_17 = arith.constant 1.000000e+00 : f32
    %33 = vector.broadcast %cst_17 : f32 to vector<8x128xf32>
    %34 = arith.addf %33, %32 : vector<8x128xf32>
    %35 = arith.divf %33, %34 : vector<8x128xf32>
    %36 = vector.extract_strided_slice %35 {offsets = [0, 0], sizes = [8, 32], strides = [1, 1]} : vector<8x128xf32> to vector<8x32xf32>
    %37 = vector.extract_strided_slice %35 {offsets = [0, 32], sizes = [8, 32], strides = [1, 1]} : vector<8x128xf32> to vector<8x32xf32>
    %38 = vector.extract_strided_slice %30 {offsets = [0, 64], sizes = [8, 32], strides = [1, 1]} : vector<8x128xf32> to vector<8x32xf32>
    %39 = math.tanh %38 : vector<8x32xf32>
    %40 = vector.extract_strided_slice %35 {offsets = [0, 96], sizes = [8, 32], strides = [1, 1]} : vector<8x128xf32> to vector<8x32xf32>
    %41 = arith.mulf %37, %25 : vector<8x32xf32>
    %42 = arith.mulf %36, %39 : vector<8x32xf32>
    %43 = arith.addf %41, %42 : vector<8x32xf32>
    %44 = math.tanh %43 : vector<8x32xf32>
    %45 = arith.mulf %40, %44 : vector<8x32xf32>
    %c16 = arith.constant 16 : index
    %c0_18 = arith.constant 0 : index
    %46 = vector.load %arg9[%c16, %c0_18] : memref<64x128xf32, #tpu.memory_space<vmem>>, vector<8x128xf32>
    %cst_19 = arith.constant dense<0.000000e+00> : vector<8x128xf32>
    %47 = tpu.matmul %45, %7, %cst_19 {dimension_numbers = #tpu.dot_dimension_numbers<[1], [0], [0], [1], [0, 0, 1, 1], [], []>} : vector<8x32xf32>, vector<32x128xf32>, vector<8x128xf32> -> vector<8x128xf32>
    %48 = arith.addf %46, %47 : vector<8x128xf32>
    %49 = arith.negf %48 : vector<8x128xf32>
    %50 = math.exp %49 : vector<8x128xf32>
    %cst_20 = arith.constant 1.000000e+00 : f32
    %51 = vector.broadcast %cst_20 : f32 to vector<8x128xf32>
    %52 = arith.addf %51, %50 : vector<8x128xf32>
    %53 = arith.divf %51, %52 : vector<8x128xf32>
    %54 = vector.extract_strided_slice %53 {offsets = [0, 0], sizes = [8, 32], strides = [1, 1]} : vector<8x128xf32> to vector<8x32xf32>
    %55 = vector.extract_strided_slice %53 {offsets = [0, 32], sizes = [8, 32], strides = [1, 1]} : vector<8x128xf32> to vector<8x32xf32>
    %56 = vector.extract_strided_slice %48 {offsets = [0, 64], sizes = [8, 32], strides = [1, 1]} : vector<8x128xf32> to vector<8x32xf32>
    %57 = math.tanh %56 : vector<8x32xf32>
    %58 = vector.extract_strided_slice %53 {offsets = [0, 96], sizes = [8, 32], strides = [1, 1]} : vector<8x128xf32> to vector<8x32xf32>
    %59 = arith.mulf %55, %43 : vector<8x32xf32>
    %60 = arith.mulf %54, %57 : vector<8x32xf32>
    %61 = arith.addf %59, %60 : vector<8x32xf32>
    %62 = math.tanh %61 : vector<8x32xf32>
    %63 = arith.mulf %58, %62 : vector<8x32xf32>
    %c24 = arith.constant 24 : index
    %c0_21 = arith.constant 0 : index
    %64 = vector.load %arg9[%c24, %c0_21] : memref<64x128xf32, #tpu.memory_space<vmem>>, vector<8x128xf32>
    %cst_22 = arith.constant dense<0.000000e+00> : vector<8x128xf32>
    %65 = tpu.matmul %63, %7, %cst_22 {dimension_numbers = #tpu.dot_dimension_numbers<[1], [0], [0], [1], [0, 0, 1, 1], [], []>} : vector<8x32xf32>, vector<32x128xf32>, vector<8x128xf32> -> vector<8x128xf32>
    %66 = arith.addf %64, %65 : vector<8x128xf32>
    %67 = arith.negf %66 : vector<8x128xf32>
    %68 = math.exp %67 : vector<8x128xf32>
    %cst_23 = arith.constant 1.000000e+00 : f32
    %69 = vector.broadcast %cst_23 : f32 to vector<8x128xf32>
    %70 = arith.addf %69, %68 : vector<8x128xf32>
    %71 = arith.divf %69, %70 : vector<8x128xf32>
    %72 = vector.extract_strided_slice %71 {offsets = [0, 0], sizes = [8, 32], strides = [1, 1]} : vector<8x128xf32> to vector<8x32xf32>
    %73 = vector.extract_strided_slice %71 {offsets = [0, 32], sizes = [8, 32], strides = [1, 1]} : vector<8x128xf32> to vector<8x32xf32>
    %74 = vector.extract_strided_slice %66 {offsets = [0, 64], sizes = [8, 32], strides = [1, 1]} : vector<8x128xf32> to vector<8x32xf32>
    %75 = math.tanh %74 : vector<8x32xf32>
    %76 = vector.extract_strided_slice %71 {offsets = [0, 96], sizes = [8, 32], strides = [1, 1]} : vector<8x128xf32> to vector<8x32xf32>
    %77 = arith.mulf %73, %61 : vector<8x32xf32>
    %78 = arith.mulf %72, %75 : vector<8x32xf32>
    %79 = arith.addf %77, %78 : vector<8x32xf32>
    %80 = math.tanh %79 : vector<8x32xf32>
    %81 = arith.mulf %76, %80 : vector<8x32xf32>
    %c32 = arith.constant 32 : index
    %c0_24 = arith.constant 0 : index
    %82 = vector.load %arg9[%c32, %c0_24] : memref<64x128xf32, #tpu.memory_space<vmem>>, vector<8x128xf32>
    %cst_25 = arith.constant dense<0.000000e+00> : vector<8x128xf32>
    %83 = tpu.matmul %81, %7, %cst_25 {dimension_numbers = #tpu.dot_dimension_numbers<[1], [0], [0], [1], [0, 0, 1, 1], [], []>} : vector<8x32xf32>, vector<32x128xf32>, vector<8x128xf32> -> vector<8x128xf32>
    %84 = arith.addf %82, %83 : vector<8x128xf32>
    %85 = arith.negf %84 : vector<8x128xf32>
    %86 = math.exp %85 : vector<8x128xf32>
    %cst_26 = arith.constant 1.000000e+00 : f32
    %87 = vector.broadcast %cst_26 : f32 to vector<8x128xf32>
    %88 = arith.addf %87, %86 : vector<8x128xf32>
    %89 = arith.divf %87, %88 : vector<8x128xf32>
    %90 = vector.extract_strided_slice %89 {offsets = [0, 0], sizes = [8, 32], strides = [1, 1]} : vector<8x128xf32> to vector<8x32xf32>
    %91 = vector.extract_strided_slice %89 {offsets = [0, 32], sizes = [8, 32], strides = [1, 1]} : vector<8x128xf32> to vector<8x32xf32>
    %92 = vector.extract_strided_slice %84 {offsets = [0, 64], sizes = [8, 32], strides = [1, 1]} : vector<8x128xf32> to vector<8x32xf32>
    %93 = math.tanh %92 : vector<8x32xf32>
    %94 = vector.extract_strided_slice %89 {offsets = [0, 96], sizes = [8, 32], strides = [1, 1]} : vector<8x128xf32> to vector<8x32xf32>
    %95 = arith.mulf %91, %79 : vector<8x32xf32>
    %96 = arith.mulf %90, %93 : vector<8x32xf32>
    %97 = arith.addf %95, %96 : vector<8x32xf32>
    %98 = math.tanh %97 : vector<8x32xf32>
    %99 = arith.mulf %94, %98 : vector<8x32xf32>
    %c40 = arith.constant 40 : index
    %c0_27 = arith.constant 0 : index
    %100 = vector.load %arg9[%c40, %c0_27] : memref<64x128xf32, #tpu.memory_space<vmem>>, vector<8x128xf32>
    %cst_28 = arith.constant dense<0.000000e+00> : vector<8x128xf32>
    %101 = tpu.matmul %99, %7, %cst_28 {dimension_numbers = #tpu.dot_dimension_numbers<[1], [0], [0], [1], [0, 0, 1, 1], [], []>} : vector<8x32xf32>, vector<32x128xf32>, vector<8x128xf32> -> vector<8x128xf32>
    %102 = arith.addf %100, %101 : vector<8x128xf32>
    %103 = arith.negf %102 : vector<8x128xf32>
    %104 = math.exp %103 : vector<8x128xf32>
    %cst_29 = arith.constant 1.000000e+00 : f32
    %105 = vector.broadcast %cst_29 : f32 to vector<8x128xf32>
    %106 = arith.addf %105, %104 : vector<8x128xf32>
    %107 = arith.divf %105, %106 : vector<8x128xf32>
    %108 = vector.extract_strided_slice %107 {offsets = [0, 0], sizes = [8, 32], strides = [1, 1]} : vector<8x128xf32> to vector<8x32xf32>
    %109 = vector.extract_strided_slice %107 {offsets = [0, 32], sizes = [8, 32], strides = [1, 1]} : vector<8x128xf32> to vector<8x32xf32>
    %110 = vector.extract_strided_slice %102 {offsets = [0, 64], sizes = [8, 32], strides = [1, 1]} : vector<8x128xf32> to vector<8x32xf32>
    %111 = math.tanh %110 : vector<8x32xf32>
    %112 = vector.extract_strided_slice %107 {offsets = [0, 96], sizes = [8, 32], strides = [1, 1]} : vector<8x128xf32> to vector<8x32xf32>
    %113 = arith.mulf %109, %97 : vector<8x32xf32>
    %114 = arith.mulf %108, %111 : vector<8x32xf32>
    %115 = arith.addf %113, %114 : vector<8x32xf32>
    %116 = math.tanh %115 : vector<8x32xf32>
    %117 = arith.mulf %112, %116 : vector<8x32xf32>
    %c48 = arith.constant 48 : index
    %c0_30 = arith.constant 0 : index
    %118 = vector.load %arg9[%c48, %c0_30] : memref<64x128xf32, #tpu.memory_space<vmem>>, vector<8x128xf32>
    %cst_31 = arith.constant dense<0.000000e+00> : vector<8x128xf32>
    %119 = tpu.matmul %117, %7, %cst_31 {dimension_numbers = #tpu.dot_dimension_numbers<[1], [0], [0], [1], [0, 0, 1, 1], [], []>} : vector<8x32xf32>, vector<32x128xf32>, vector<8x128xf32> -> vector<8x128xf32>
    %120 = arith.addf %118, %119 : vector<8x128xf32>
    %121 = arith.negf %120 : vector<8x128xf32>
    %122 = math.exp %121 : vector<8x128xf32>
    %cst_32 = arith.constant 1.000000e+00 : f32
    %123 = vector.broadcast %cst_32 : f32 to vector<8x128xf32>
    %124 = arith.addf %123, %122 : vector<8x128xf32>
    %125 = arith.divf %123, %124 : vector<8x128xf32>
    %126 = vector.extract_strided_slice %125 {offsets = [0, 0], sizes = [8, 32], strides = [1, 1]} : vector<8x128xf32> to vector<8x32xf32>
    %127 = vector.extract_strided_slice %125 {offsets = [0, 32], sizes = [8, 32], strides = [1, 1]} : vector<8x128xf32> to vector<8x32xf32>
    %128 = vector.extract_strided_slice %120 {offsets = [0, 64], sizes = [8, 32], strides = [1, 1]} : vector<8x128xf32> to vector<8x32xf32>
    %129 = math.tanh %128 : vector<8x32xf32>
    %130 = vector.extract_strided_slice %125 {offsets = [0, 96], sizes = [8, 32], strides = [1, 1]} : vector<8x128xf32> to vector<8x32xf32>
    %131 = arith.mulf %127, %115 : vector<8x32xf32>
    %132 = arith.mulf %126, %129 : vector<8x32xf32>
    %133 = arith.addf %131, %132 : vector<8x32xf32>
    %134 = math.tanh %133 : vector<8x32xf32>
    %135 = arith.mulf %130, %134 : vector<8x32xf32>
    %c56 = arith.constant 56 : index
    %c0_33 = arith.constant 0 : index
    %136 = vector.load %arg9[%c56, %c0_33] : memref<64x128xf32, #tpu.memory_space<vmem>>, vector<8x128xf32>
    %cst_34 = arith.constant dense<0.000000e+00> : vector<8x128xf32>
    %137 = tpu.matmul %135, %7, %cst_34 {dimension_numbers = #tpu.dot_dimension_numbers<[1], [0], [0], [1], [0, 0, 1, 1], [], []>} : vector<8x32xf32>, vector<32x128xf32>, vector<8x128xf32> -> vector<8x128xf32>
    %138 = arith.addf %136, %137 : vector<8x128xf32>
    %139 = arith.negf %138 : vector<8x128xf32>
    %140 = math.exp %139 : vector<8x128xf32>
    %cst_35 = arith.constant 1.000000e+00 : f32
    %141 = vector.broadcast %cst_35 : f32 to vector<8x128xf32>
    %142 = arith.addf %141, %140 : vector<8x128xf32>
    %143 = arith.divf %141, %142 : vector<8x128xf32>
    %144 = vector.extract_strided_slice %143 {offsets = [0, 0], sizes = [8, 32], strides = [1, 1]} : vector<8x128xf32> to vector<8x32xf32>
    %145 = vector.extract_strided_slice %143 {offsets = [0, 32], sizes = [8, 32], strides = [1, 1]} : vector<8x128xf32> to vector<8x32xf32>
    %146 = vector.extract_strided_slice %138 {offsets = [0, 64], sizes = [8, 32], strides = [1, 1]} : vector<8x128xf32> to vector<8x32xf32>
    %147 = math.tanh %146 : vector<8x32xf32>
    %148 = vector.extract_strided_slice %143 {offsets = [0, 96], sizes = [8, 32], strides = [1, 1]} : vector<8x128xf32> to vector<8x32xf32>
    %149 = arith.mulf %145, %133 : vector<8x32xf32>
    %150 = arith.mulf %144, %147 : vector<8x32xf32>
    %151 = arith.addf %149, %150 : vector<8x32xf32>
    %152 = math.tanh %151 : vector<8x32xf32>
    %153 = arith.mulf %148, %152 : vector<8x32xf32>
    %c0_36 = arith.constant 0 : index
    %c0_37 = arith.constant 0 : index
    %154 = vector.load %arg8[%c0_36, %c0_37] : memref<8x32xf32, #tpu.memory_space<vmem>>, vector<8x32xf32>
    tpu.vector_store %arg8[%c0_36, %c0_37], %153 {strides = array<i32>} : memref<8x32xf32, #tpu.memory_space<vmem>>, vector<8x32xf32>,
    %c0_38 = arith.constant 0 : index
    %c0_39 = arith.constant 0 : index
    %155 = vector.load %arg5[%c0_38, %c0_39] : memref<32x3xf32, #tpu.memory_space<vmem>>, vector<32x3xf32>
    %cst_40 = arith.constant dense<0.000000e+00> : vector<8x3xf32>
    %156 = tpu.matmul %153, %155, %cst_40 {dimension_numbers = #tpu.dot_dimension_numbers<[1], [0], [0], [1], [0, 0, 1, 1], [], []>} : vector<8x32xf32>, vector<32x3xf32>, vector<8x3xf32> -> vector<8x3xf32>
    %c0_41 = arith.constant 0 : index
    %c0_42 = arith.constant 0 : index
    %157 = vector.load %arg6[%c0_41, %c0_42] : memref<1x3xf32, #tpu.memory_space<vmem>>, vector<1x3xf32>
    %158 = vector.broadcast %157 : vector<1x3xf32> to vector<8x3xf32>
    %159 = arith.addf %156, %158 : vector<8x3xf32>
    %160 = arith.negf %159 : vector<8x3xf32>
    %161 = math.exp %160 : vector<8x3xf32>
    %cst_43 = arith.constant 1.000000e+00 : f32
    %162 = vector.broadcast %cst_43 : f32 to vector<8x3xf32>
    %163 = arith.addf %162, %161 : vector<8x3xf32>
    %164 = arith.divf %162, %163 : vector<8x3xf32>
    %c0_44 = arith.constant 0 : index
    %c0_45 = arith.constant 0 : index
    %165 = vector.load %arg7[%c0_44, %c0_45] : memref<8x3xf32, #tpu.memory_space<vmem>>, vector<8x3xf32>
    tpu.vector_store %arg7[%c0_44, %c0_45], %164 {strides = array<i32>} : memref<8x3xf32, #tpu.memory_space<vmem>>, vector<8x3xf32>,
    return
  }
  func.func @transform_0(%arg0: i32) -> (i32, i32) {
    %c0_i32 = arith.constant 0 : i32
    %c0_i32_0 = arith.constant 0 : i32
    %c0_i32_1 = arith.constant 0 : i32
    return %c0_i32, %c0_i32_0 : i32, i32
  }
  func.func @transform_1(%arg0: i32) -> (i32, i32) {
    %c0_i32 = arith.constant 0 : i32
    %c0_i32_0 = arith.constant 0 : i32
    %c0_i32_1 = arith.constant 0 : i32
    return %c0_i32, %c0_i32_0 : i32, i32
  }
  func.func @transform_2(%arg0: i32) -> (i32, i32) {
    %c0_i32 = arith.constant 0 : i32
    %c0_i32_0 = arith.constant 0 : i32
    %c0_i32_1 = arith.constant 0 : i32
    return %c0_i32, %c0_i32_0 : i32, i32
  }
  func.func @transform_3(%arg0: i32) -> (i32, i32) {
    %c0_i32 = arith.constant 0 : i32
    %c0_i32_0 = arith.constant 0 : i32
    %c0_i32_1 = arith.constant 0 : i32
    return %c0_i32, %c0_i32_0 : i32, i32
  }
  func.func @transform_4(%arg0: i32) -> (i32, i32) {
    %c0_i32 = arith.constant 0 : i32
    %c0_i32_0 = arith.constant 0 : i32
    %c0_i32_1 = arith.constant 0 : i32
    return %c0_i32, %c0_i32_0 : i32, i32
  }
  func.func @transform_5(%arg0: i32) -> (i32, i32) {
    %c0_i32 = arith.constant 0 : i32
    %c0_i32_0 = arith.constant 0 : i32
    %c0_i32_1 = arith.constant 0 : i32
    return %c0_i32, %c0_i32_0 : i32, i32
  }
  func.func @transform_6(%arg0: i32) -> (i32, i32) {
    %c0_i32 = arith.constant 0 : i32
    %c0_i32_0 = arith.constant 0 : i32
    %c0_i32_1 = arith.constant 0 : i32
    return %c0_i32, %c0_i32_0 : i32, i32
  }
  func.func @transform_7(%arg0: i32) -> (i32, i32) {
    %c0_i32 = arith.constant 0 : i32
    %c0_i32_0 = arith.constant 0 : i32
    %c0_i32_1 = arith.constant 0 : i32
    return %c0_i32, %c0_i32_0 : i32, i32
  }
}

</mosaic_0001>

<bundles_post_ra>
// kernel: tpu_custom_call.1
= control target key start
LH: loop header
LB: loop body
LE: loop exit
PB: predicated region body
PF: predicated region fallthrough
CT: control target
= control target key end

     0   :  { %v1398_v3 = vmov 0.0   ;;  %vm43_vm0 = vcmask 130048   ;;  %s1675_s0 = inlined_call_operand.vmem [shape: f32[64,16], index: 0, kind: input, shape index: {}]   ;;  %s1676_s1 = inlined_call_operand.vmem [shape: f32[16,128], index: 1, kind: input, shape index: {}]   ;;  %s1677_s2 = inlined_call_operand.vmem [shape: f32[32,128], index: 2, kind: input, shape index: {}]   ;;  %s1678_s3 = inlined_call_operand.vmem [shape: f32[1,128], index: 3, kind: input, shape index: {}]   ;;  %s1679_s4 = inlined_call_operand.vmem [shape: f32[32,3], index: 4, kind: input, shape index: {}]   ;;  %s1680_s5 = inlined_call_operand.vmem [shape: f32[1,3], index: 5, kind: input, shape index: {}]   ;;  %s1681_s6 = inlined_call_operand.vmem [shape: f32[8,3], index: 6, kind: output, shape index: {0}]   ;;  %s1682_s7 = inlined_call_operand.hbm [shape: f32[8,32], index: 7, kind: output, shape index: {1}]  }
   0x1   :  { %v35_v0 = vld [vmem:[%s1676_s1 + $0x8] sm:$0xff]  ;;  %v1449_v1 = vld [vmem:[%s1677_s2 + $0x18] sm:$0xff]  ;;  %v34_v2 = vld [vmem:[%s1676_s1] sm:$0xff]  ;;  %1204 = vmatprep.subr.mxu1 %v1398_v3 }
   0x2   :  { %1188 = vmatprep.subr.mxu0 %v35_v0  ;;  %v26_v4 = vld [vmem:[%s1675_s0] sm:$0xff]  ;;  %1205 = vmatpush3.msra.mxu1 %v1449_v1  ;;  %v1462_v5 = vld [vmem:[%s1677_s2 + $0x10] sm:$0xff]  ;;  %v27_v6 = vld [vmem:[%s1675_s0 + $0x8] sm:$0xff] }
   0x3   :  { %1189 = vmatpush3.msra.mxu0 %v35_v0 }
   0x4   :  { %13 = vsyncpa [#allocation4], 0  ;;  %1190 = vmatprep.subr.mxu0 %v34_v2  ;;  %1206 = vmatprep.subr.mxu1 %v1398_v3  ;;  %v1472_v7 = vld [vmem:[%s1677_s2 + $0x8] sm:$0xff]  ;;  %v1480_v8 = vld [vmem:[%s1677_s2] sm:$0xff]  ;;  %vm1399_vm1 = vmmov 0   ;;  %s1400_s17 = smov 64  }
   0x5   :  { %1191 = vmatpush3.msra.mxu0 %v34_v2  ;;  %1192 = vmatprep.mubr.msk.f32.mxu0 %vm43_vm0, %v26_v4  ;;  %v1511_v10 = vld [vmem:[%s1678_s3] ss:$0 sm:$0xff]  ;;  %s1401_s3 = smov 32   ;;  %vm186_vm2 = vcmask 261120   ;;  %v28_v44 = vld [vmem:[%s1675_s0 + $0x10] sm:$0xff]  ;;  %v29_v45 = vld [vmem:[%s1675_s0 + $0x18] sm:$0xff] }
   0x6   :  { %1207 = vmatpush3.msra.mxu1 %v1462_v5  ;;  %1193 = vmatmul.mubr.msk.f32.vlgmr.msra.gmra.mxu0 %vm43_vm0, %v27_v6  ;;  %v30_v46 = vld [vmem:[%s1675_s0 + $0x20] sm:$0xff]  ;;  %v31_v47 = vld [vmem:[%s1675_s0 + $0x28] sm:$0xff]  ;;  %v32_v48 = vld [vmem:[%s1675_s0 + $0x30] sm:$0xff]  ;;  %s1402_s13 = smov [#allocation3]  }
   0x7   :  { %1208 = vmatprep.subr.mxu1 %v1398_v3  ;;  %1212 = vmatprep.mubr.msk.f32.mxu1 %vm1399_vm1, %v1398_v3  ;;  %v33_v49 = vld [vmem:[%s1675_s0 + $0x38] sm:$0xff]  ;;  %s1096_s14 = sshll.u32 %s1402_s13, 4  ;;  %s1097_s14 = int_to_ptr.vmem [resolvable:$true] %s1096_s14 }
   0x8   :  { %1209 = vmatpush3.msra.mxu1 %v1472_v7  ;;  %1226 = vmatprep.subr.mxu0 %v1398_v3  ;;  %p1381_p1 = scmp.lt.s32.totalorder %s1097_s14, %s1097_s14 }
   0x9   :  { %1210 = vmatprep.subr.mxu1 %v1398_v3  ;;  %1227 = vmatpush3.msra.mxu0 %v1449_v1 }
   0xa   :  { %1211 = vmatpush3.msra.mxu1 %v1480_v8  ;;  %1228 = vmatprep.subr.mxu0 %v1398_v3 }
   0xb   :  { %1213 = vmatmul.mubr.f32.vlgmr.msra.gmra.mxu1 %v1398_v3  ;;  %1215 = vmatprep.subr.mxu1 %v1398_v3 }
   0xc   :  { %1216 = vmatpush3.msra.mxu1 %v1449_v1  ;;  %1223 = vmatprep.mubr.msk.f32.mxu1 %vm1399_vm1, %v1398_v3 }
   0xd   :  { %1217 = vmatprep.subr.mxu1 %v1398_v3  ;;  %1229 = vmatpush3.msra.mxu0 %v1462_v5 }
   0xe   :  { %1218 = vmatpush3.msra.mxu1 %v1462_v5  ;;  %1230 = vmatprep.subr.mxu0 %v1398_v3 }
   0xf   :  { %1219 = vmatprep.subr.mxu1 %v1398_v3  ;;  %1231 = vmatpush3.msra.mxu0 %v1472_v7 }
  0x10   :  { %1220 = vmatpush3.msra.mxu1 %v1472_v7  ;;  %1232 = vmatprep.subr.mxu0 %v1398_v3 }
  0x11   :  { %1221 = vmatprep.subr.mxu1 %v1398_v3  ;;  %1233 = vmatpush3.msra.mxu0 %v1480_v8 }
  0x12   :  { %1222 = vmatpush3.msra.mxu1 %v1480_v8  ;;  %1248 = vmatprep.subr.mxu0 %v1398_v3 }
  0x13   :  { %1237 = vmatprep.subr.mxu1 %v1398_v3  ;;  %1195 = vmatprep.mubr.msk.f32.mxu0 %vm43_vm0, %v28_v44 }
  0x14   :  { %1196 = vmatmul.mubr.msk.f32.gmra.mxu0 %vm43_vm0, %v29_v45 }
  0x15   :  { %1198 = vmatprep.mubr.msk.f32.mxu0 %vm43_vm0, %v30_v46 }
  0x18   :  { %1199 = vmatmul.mubr.msk.f32.gmra.mxu0 %vm43_vm0, %v31_v47 }
  0x19   :  { %1201 = vmatprep.mubr.msk.f32.mxu0 %vm43_vm0, %v32_v48 }
  0x1c   :  { %1202 = vmatmul.mubr.msk.f32.gmra.mxu0 %vm43_vm0, %v33_v49 }
  0x1d   :  { %1234 = vmatprep.mubr.msk.f32.mxu0 %vm1399_vm1, %v1398_v3 }
  0xc6   :  { %v1194_v9 = vpop.f32.mrf.mxu0 }
  0xc7   :  { %v140_v30 = vadd.f32 %v1194_v9, %v1511_v10 }
  0xc8   :  { %v134_v11 = vpop.f32.mrf.mxu0 }
  0xc9   :  { %v135_v12 = vadd.f32 %v1511_v10, %v134_v11 }
  0xcb   :  { %v256_v13 = vpop.f32.mrf.mxu1 }
  0xcc   :  { %v260_v14 = vadd.f32 %v256_v13, %v135_v12 }
  0xcd   :  { %v1214_v15 = vpop.f32.mrf.mxu1 }
  0xce   :  { %1308 = vtanh.f32 %v260_v14  ;;  %v1115_v17 = vmul.f32 -1.442695, %v260_v14 }
  0xd0   :  { %1310 = vpow2.f32 %v1115_v17 }
  0xd4   :  { %v1197_v54 = vpop.f32.mrf.mxu0 }
  0xd6   :  { %v144_v55 = vpop.f32.mrf.mxu0 }
  0xd7   :  { %v145_v60 = vadd.f32 %v1511_v10, %v144_v55 }
  0xd8   :  { %v1571_v56 = vpop.f32.mrf.mxu0 }
  0xda   :  { %v1573_v57 = vpop.f32.mrf.mxu0 }
  0xdb   :  { %v1309_v16 = vpop.eup %1308 }
  0xdc   :  { %270 = vrot.lane.b32.xlu0 %v1309_v16, %s1400_s17  ;;  %v1575_v58 = vpop.f32.mrf.mxu0 }
  0xdd   :  { %v1311_v18 = vpop.eup %1310 }
  0xde   :  { %v264_v19 = vadd.f32 1.0, %v1311_v18  ;;  %v1577_v59 = vpop.f32.mrf.mxu0 }
  0xe0   :  { %1312 = vrcp.f32 %v264_v19 }
  0xed   :  { %v1313_v20 = vpop.eup %1312 }
  0xee   :  { %v268_v23 = vmul.f32 0.0, %v1313_v20 }
 0x14e   :  { %v271_v21 = vpop.permute.xlu0 %270 }
 0x14f   :  { %v273_v22 = vmul.f32 %v1313_v20, %v271_v21 }
 0x151   :  { %275 = vrot.lane.b32.xlu0 %v273_v22, %s1401_s3 }
 0x1c3   :  { %v276_v24 = vpop.permute.xlu0 %275 }
 0x1c4   :  { %v278_v25 = vadd.f32 %v276_v24, %v268_v23 }
 0x1c6   :  { %1314 = vtanh.f32 %v278_v25 }
 0x1d3   :  { %v1315_v26 = vpop.eup %1314 }
 0x1d4   :  { %281 = vrot.lane.b32.xlu1 %v1315_v26, %s1400_s17 }
 0x246   :  { %v282_v27 = vpop.permute.xlu1 %281 }
 0x247   :  { %v284_v28 = vmul.f32 %v1313_v20, %v282_v27  ;;  %v150_v20 = vadd.f32 %v1197_v54, %v1511_v10 }
 0x249   :  { %287 = vrot.lane.b32.xlu1 %v284_v28, %s1401_s3 }
 0x2bb   :  { %v288_v29 = vpop.permute.xlu1 %287 }
 0x2bc   :  { %1224 = vmatmul.mubr.msk.f32.vlgmr.msra.gmra.mxu1 %vm186_vm2, %v288_v29 }
 0x2bd   :  { %1238 = vmatpush3.msra.mxu1 %v1449_v1  ;;  %1245 = vmatprep.mubr.msk.f32.mxu1 %vm1399_vm1, %v1398_v3 }
 0x2be   :  { %1239 = vmatprep.subr.mxu1 %v1398_v3 }
 0x2bf   :  { %1240 = vmatpush3.msra.mxu1 %v1462_v5 }
 0x2c0   :  { %1241 = vmatprep.subr.mxu1 %v1398_v3 }
 0x2c1   :  { %1242 = vmatpush3.msra.mxu1 %v1472_v7 }
 0x2c2   :  { %1243 = vmatprep.subr.mxu1 %v1398_v3 }
 0x2c3   :  { %1244 = vmatpush3.msra.mxu1 %v1480_v8 }
 0x2c4   :  { %1259 = vmatprep.subr.mxu1 %v1398_v3 }
 0x37c   :  { %v357_v31 = vpop.f32.mrf.mxu1 }
 0x37d   :  { %v361_v32 = vadd.f32 %v357_v31, %v140_v30 }
 0x37e   :  { %v1225_v33 = vpop.f32.mrf.mxu1 }
 0x37f   :  { %1316 = vtanh.f32 %v361_v32  ;;  %v1117_v35 = vmul.f32 -1.442695, %v361_v32 }
 0x381   :  { %1318 = vpow2.f32 %v1117_v35 }
 0x38c   :  { %v1317_v34 = vpop.eup %1316 }
 0x38d   :  { %371 = vrot.lane.b32.xlu0 %v1317_v34, %s1400_s17 }
 0x38e   :  { %v1319_v36 = vpop.eup %1318 }
 0x38f   :  { %v365_v37 = vadd.f32 1.0, %v1319_v36 }
 0x391   :  { %1320 = vrcp.f32 %v365_v37 }
 0x39e   :  { %v1321_v38 = vpop.eup %1320 }
 0x39f   :  { %v369_v41 = vmul.f32 %v1321_v38, %v278_v25 }
 0x3ff   :  { %v372_v39 = vpop.permute.xlu0 %371 }
 0x400   :  { %v374_v40 = vmul.f32 %v1321_v38, %v372_v39 }
 0x402   :  { %376 = vrot.lane.b32.xlu1 %v374_v40, %s1401_s3 }
 0x474   :  { %v377_v42 = vpop.permute.xlu1 %376 }
 0x475   :  { %v379_v43 = vadd.f32 %v377_v42, %v369_v41 }
 0x477   :  { %1322 = vtanh.f32 %v379_v43 }
 0x484   :  { %v1323_v50 = vpop.eup %1322 }
 0x485   :  { %382 = vrot.lane.b32.xlu0 %v1323_v50, %s1400_s17 }
 0x4f7   :  { %v383_v51 = vpop.permute.xlu0 %382 }
 0x4f8   :  { %v385_v52 = vmul.f32 %v1321_v38, %v383_v51  ;;  %v155_v38 = vadd.f32 %v1511_v10, %v1573_v57  ;;  %v160_v57 = vadd.f32 %v1571_v56, %v1511_v10 }
 0x4fa   :  { %388 = vrot.lane.b32.xlu1 %v385_v52, %s1401_s3 }
 0x56c   :  { %v389_v53 = vpop.permute.xlu1 %388 }
 0x56d   :  { %1235 = vmatmul.mubr.msk.f32.vlgmr.msra.gmra.mxu0 %vm186_vm2, %v389_v53 }
 0x56e   :  { %1249 = vmatpush3.msra.mxu0 %v1449_v1  ;;  %1256 = vmatprep.mubr.msk.f32.mxu0 %vm1399_vm1, %v1398_v3 }
 0x56f   :  { %1250 = vmatprep.subr.mxu0 %v1398_v3 }
 0x570   :  { %1251 = vmatpush3.msra.mxu0 %v1462_v5 }
 0x571   :  { %1252 = vmatprep.subr.mxu0 %v1398_v3 }
 0x572   :  { %1253 = vmatpush3.msra.mxu0 %v1472_v7 }
 0x573   :  { %1254 = vmatprep.subr.mxu0 %v1398_v3 }
 0x574   :  { %1255 = vmatpush3.msra.mxu0 %v1480_v8 }
 0x575   :  { %1270 = vmatprep.subr.mxu0 %v1398_v3 }
 0x62d   :  { %v458_v61 = vpop.f32.mrf.mxu0 }
 0x62e   :  { %v462_v62 = vadd.f32 %v458_v61, %v145_v60 }
 0x62f   :  { %v1236_v63 = vpop.f32.mrf.mxu0 }
 0x630   :  { %1324 = vtanh.f32 %v462_v62  ;;  %v1119_v2 = vmul.f32 -1.442695, %v462_v62 }
 0x632   :  { %1326 = vpow2.f32 %v1119_v2 }
 0x63d   :  { %v1325_v0 = vpop.eup %1324 }
 0x63e   :  { %472 = vrot.lane.b32.xlu0 %v1325_v0, %s1400_s17 }
 0x63f   :  { %v1327_v4 = vpop.eup %1326 }
 0x640   :  { %v466_v6 = vadd.f32 1.0, %v1327_v4 }
 0x642   :  { %1328 = vrcp.f32 %v466_v6 }
 0x64f   :  { %v1329_v9 = vpop.eup %1328 }
 0x650   :  { %v470_v13 = vmul.f32 %v1329_v9, %v379_v43 }
 0x6b0   :  { %v473_v11 = vpop.permute.xlu0 %472 }
 0x6b1   :  { %v475_v12 = vmul.f32 %v1329_v9, %v473_v11 }
 0x6b3   :  { %477 = vrot.lane.b32.xlu1 %v475_v12, %s1401_s3 }
 0x725   :  { %v478_v14 = vpop.permute.xlu1 %477 }
 0x726   :  { %v480_v15 = vadd.f32 %v478_v14, %v470_v13  ;;  %v165_v14 = vadd.f32 %v1511_v10, %v1577_v59 }
 0x728   :  { %1330 = vtanh.f32 %v480_v15 }
 0x735   :  { %v1331_v16 = vpop.eup %1330 }
 0x736   :  { %483 = vrot.lane.b32.xlu0 %v1331_v16, %s1400_s17 }
 0x7a8   :  { %v484_v17 = vpop.permute.xlu0 %483 }
 0x7a9   :  { %v486_v18 = vmul.f32 %v1329_v9, %v484_v17 }
 0x7ab   :  { %489 = vrot.lane.b32.xlu1 %v486_v18, %s1401_s3 }
 0x81d   :  { %v490_v19 = vpop.permute.xlu1 %489 }
 0x81e   :  { %1246 = vmatmul.mubr.msk.f32.vlgmr.msra.gmra.mxu1 %vm186_vm2, %v490_v19 }
 0x81f   :  { %1260 = vmatpush3.msra.mxu1 %v1449_v1  ;;  %1267 = vmatprep.mubr.msk.f32.mxu1 %vm1399_vm1, %v1398_v3 }
 0x820   :  { %1261 = vmatprep.subr.mxu1 %v1398_v3 }
 0x821   :  { %1262 = vmatpush3.msra.mxu1 %v1462_v5 }
 0x822   :  { %1263 = vmatprep.subr.mxu1 %v1398_v3 }
 0x823   :  { %1264 = vmatpush3.msra.mxu1 %v1472_v7 }
 0x824   :  { %1265 = vmatprep.subr.mxu1 %v1398_v3 }
 0x825   :  { %1266 = vmatpush3.msra.mxu1 %v1480_v8 }
 0x826   :  { %1281 = vmatprep.subr.mxu1 %v1398_v3 }
 0x8de   :  { %v559_v21 = vpop.f32.mrf.mxu1 }
 0x8df   :  { %v563_v22 = vadd.f32 %v559_v21, %v150_v20 }
 0x8e0   :  { %v1247_v23 = vpop.f32.mrf.mxu1 }
 0x8e1   :  { %1332 = vtanh.f32 %v563_v22  ;;  %v1121_v25 = vmul.f32 -1.442695, %v563_v22 }
 0x8e3   :  { %1334 = vpow2.f32 %v1121_v25 }
 0x8ee   :  { %v1333_v24 = vpop.eup %1332 }
 0x8ef   :  { %573 = vrot.lane.b32.xlu0 %v1333_v24, %s1400_s17 }
 0x8f0   :  { %v1335_v26 = vpop.eup %1334 }
 0x8f1   :  { %v567_v27 = vadd.f32 1.0, %v1335_v26 }
 0x8f3   :  { %1336 = vrcp.f32 %v567_v27 }
 0x900   :  { %v1337_v28 = vpop.eup %1336 }
 0x901   :  { %v571_v31 = vmul.f32 %v1337_v28, %v480_v15 }
 0x961   :  { %v574_v29 = vpop.permute.xlu0 %573 }
 0x962   :  { %v576_v30 = vmul.f32 %v1337_v28, %v574_v29 }
 0x964   :  { %578 = vrot.lane.b32.xlu1 %v576_v30, %s1401_s3 }
 0x9d6   :  { %v579_v32 = vpop.permute.xlu1 %578 }
 0x9d7   :  { %v581_v33 = vadd.f32 %v579_v32, %v571_v31  ;;  %v170_v31 = vadd.f32 %v1575_v58, %v1511_v10  ;;  %v1000_v58 = vld [vmem:[%s1679_s4 + $0x18] sm:$0xff] }
 0x9d9   :  { %1338 = vtanh.f32 %v581_v33 }
 0x9e6   :  { %v1339_v34 = vpop.eup %1338 }
 0x9e7   :  { %584 = vrot.lane.b32.xlu0 %v1339_v34, %s1400_s17 }
 0xa59   :  { %v585_v35 = vpop.permute.xlu0 %584 }
 0xa5a   :  { %v587_v36 = vmul.f32 %v1337_v28, %v585_v35 }
 0xa5c   :  { %590 = vrot.lane.b32.xlu1 %v587_v36, %s1401_s3 }
 0xace   :  { %v591_v37 = vpop.permute.xlu1 %590 }
 0xacf   :  { %1257 = vmatmul.mubr.msk.f32.vlgmr.msra.gmra.mxu0 %vm186_vm2, %v591_v37 }
 0xad0   :  { %1271 = vmatpush3.msra.mxu0 %v1449_v1  ;;  %1278 = vmatprep.mubr.msk.f32.mxu0 %vm1399_vm1, %v1398_v3 }
 0xad1   :  { %1272 = vmatprep.subr.mxu0 %v1398_v3 }
 0xad2   :  { %1273 = vmatpush3.msra.mxu0 %v1462_v5 }
 0xad3   :  { %1274 = vmatprep.subr.mxu0 %v1398_v3 }
 0xad4   :  { %1275 = vmatpush3.msra.mxu0 %v1472_v7 }
 0xad5   :  { %1276 = vmatprep.subr.mxu0 %v1398_v3 }
 0xad6   :  { %1277 = vmatpush3.msra.mxu0 %v1480_v8 }
 0xad7   :  { %1292 = vmatprep.subr.mxu0 %v1398_v3 }
 0xb8f   :  { %v660_v39 = vpop.f32.mrf.mxu0 }
 0xb90   :  { %v664_v40 = vadd.f32 %v660_v39, %v155_v38 }
 0xb91   :  { %v1258_v41 = vpop.f32.mrf.mxu0 }
 0xb92   :  { %1340 = vtanh.f32 %v664_v40  ;;  %v1123_v43 = vmul.f32 -1.442695, %v664_v40 }
 0xb94   :  { %1342 = vpow2.f32 %v1123_v43 }
 0xb9f   :  { %v1341_v42 = vpop.eup %1340 }
 0xba0   :  { %674 = vrot.lane.b32.xlu0 %v1341_v42, %s1400_s17 }
 0xba1   :  { %v1343_v44 = vpop.eup %1342 }
 0xba2   :  { %v668_v45 = vadd.f32 1.0, %v1343_v44  ;;  %v999_v44 = vld [vmem:[%s1679_s4 + $0x10] sm:$0xff] }
 0xba4   :  { %1344 = vrcp.f32 %v668_v45  ;;  %v998_v45 = vld [vmem:[%s1679_s4 + $0x8] sm:$0xff] }
 0xbb1   :  { %v1345_v46 = vpop.eup %1344 }
 0xbb2   :  { %v672_v49 = vmul.f32 %v1345_v46, %v581_v33 }
 0xc12   :  { %v675_v47 = vpop.permute.xlu0 %674 }
 0xc13   :  { %v677_v48 = vmul.f32 %v1345_v46, %v675_v47 }
 0xc15   :  { %679 = vrot.lane.b32.xlu1 %v677_v48, %s1401_s3 }
 0xc87   :  { %v680_v50 = vpop.permute.xlu1 %679 }
 0xc88   :  { %v682_v51 = vadd.f32 %v680_v50, %v672_v49 }
 0xc8a   :  { %1346 = vtanh.f32 %v682_v51 }
 0xc97   :  { %v1347_v52 = vpop.eup %1346 }
 0xc98   :  { %685 = vrot.lane.b32.xlu0 %v1347_v52, %s1400_s17 }
 0xd0a   :  { %v686_v53 = vpop.permute.xlu0 %685 }
 0xd0b   :  { %v688_v54 = vmul.f32 %v1345_v46, %v686_v53  ;;  %v997_v46 = vld [vmem:[%s1679_s4] sm:$0xff]  ;;  %s1376_s4 = scalar_lea.vmem %s1097_s14, 128 }
 0xd0c   :  { %p1377_p0 = scmp.ne.s32.totalorder %s1097_s14, %s1376_s4  ;;  %p1382_p2 = scmp.lt.s32.totalorder %s1376_s4, %s1376_s4 }
 0xd0d   :  { %691 = vrot.lane.b32.xlu1 %v688_v54, %s1401_s3 }
 0xd0e   :  { %p1383_p3 = por %p1382_p2, %p1381_p1 }
 0xd10   :  { %p1384_p4 = pnand %p1383_p3, %p1377_p0 }
 0xd7f   :  { %v692_v55 = vpop.permute.xlu1 %691 }
 0xd80   :  { %1268 = vmatmul.mubr.msk.f32.vlgmr.msra.gmra.mxu1 %vm186_vm2, %v692_v55 }
 0xd81   :  { %1282 = vmatpush3.msra.mxu1 %v1449_v1  ;;  %1289 = vmatprep.mubr.msk.f32.mxu1 %vm1399_vm1, %v1398_v3 }
 0xd82   :  { %1283 = vmatprep.subr.mxu1 %v1398_v3 }
 0xd83   :  { %1284 = vmatpush3.msra.mxu1 %v1462_v5 }
 0xd84   :  { %1285 = vmatprep.subr.mxu1 %v1398_v3 }
 0xd85   :  { %1286 = vmatpush3.msra.mxu1 %v1472_v7 }
 0xd86   :  { %1287 = vmatprep.subr.mxu1 %v1398_v3 }
 0xd87   :  { %1288 = vmatpush3.msra.mxu1 %v1480_v8 }
 0xe40   :  { %v761_v60 = vpop.f32.mrf.mxu1 }
 0xe41   :  { %v765_v1 = vadd.f32 %v761_v60, %v160_v57 }
 0xe42   :  { %v1269_v61 = vpop.f32.mrf.mxu1 }
 0xe43   :  { %1348 = vtanh.f32 %v765_v1  ;;  %v1125_v63 = vmul.f32 -1.442695, %v765_v1 }
 0xe45   :  { %1350 = vpow2.f32 %v1125_v63 }
 0xe50   :  { %v1349_v62 = vpop.eup %1348 }
 0xe51   :  { %775 = vrot.lane.b32.xlu0 %v1349_v62, %s1400_s17 }
 0xe52   :  { %v1351_v5 = vpop.eup %1350 }
 0xe53   :  { %v769_v0 = vadd.f32 1.0, %v1351_v5 }
 0xe55   :  { %1352 = vrcp.f32 %v769_v0 }
 0xe62   :  { %v1353_v7 = vpop.eup %1352 }
 0xe63   :  { %v773_v8 = vmul.f32 %v1353_v7, %v682_v51 }
 0xec3   :  { %v776_v2 = vpop.permute.xlu0 %775 }
 0xec4   :  { %v778_v4 = vmul.f32 %v1353_v7, %v776_v2 }
 0xec6   :  { %780 = vrot.lane.b32.xlu1 %v778_v4, %s1401_s3 }
 0xf38   :  { %v781_v6 = vpop.permute.xlu1 %780 }
 0xf39   :  { %v783_v56 = vadd.f32 %v781_v6, %v773_v8 }
 0xf3b   :  { %1354 = vtanh.f32 %v783_v56 }
 0xf48   :  { %v1355_v9 = vpop.eup %1354 }
 0xf49   :  { %786 = vrot.lane.b32.xlu0 %v1355_v9, %s1400_s17 }
 0xfbb   :  { %v787_v11 = vpop.permute.xlu0 %786 }
 0xfbc   :  { %v789_v12 = vmul.f32 %v1353_v7, %v787_v11 }
 0xfbe   :  { %792 = vrot.lane.b32.xlu1 %v789_v12, %s1401_s3 }
0x1030   :  { %v793_v13 = vpop.permute.xlu1 %792 }
0x1031   :  { %1279 = vmatmul.mubr.msk.f32.vlgmr.msra.gmra.mxu0 %vm186_vm2, %v793_v13 }
0x1032   :  { %1300 = vmatprep.mubr.msk.f32.mxu0 %vm1399_vm1, %v1398_v3  ;;  %1293 = vmatpush3.msra.mxu0 %v1000_v58 }
0x1033   :  { %1294 = vmatprep.subr.mxu0 %v1398_v3 }
0x1034   :  { %1295 = vmatpush3.msra.mxu0 %v999_v44 }
0x1035   :  { %1296 = vmatprep.subr.mxu0 %v1398_v3 }
0x1036   :  { %1297 = vmatpush3.msra.mxu0 %v998_v45 }
0x1037   :  { %1298 = vmatprep.subr.mxu0 %v1398_v3 }
0x1038   :  { %1299 = vmatpush3.msra.mxu0 %v997_v46 }
0x10f1   :  { %v862_v15 = vpop.f32.mrf.mxu0 }
0x10f2   :  { %v866_v16 = vadd.f32 %v862_v15, %v165_v14 }
0x10f3   :  { %v1280_v17 = vpop.f32.mrf.mxu0 }
0x10f4   :  { %1356 = vtanh.f32 %v866_v16  ;;  %v1127_v19 = vmul.f32 -1.442695, %v866_v16 }
0x10f6   :  { %1358 = vpow2.f32 %v1127_v19 }
0x1101   :  { %v1357_v18 = vpop.eup %1356 }
0x1102   :  { %876 = vrot.lane.b32.xlu0 %v1357_v18, %s1400_s17 }
0x1103   :  { %v1359_v20 = vpop.eup %1358 }
0x1104   :  { %v870_v21 = vadd.f32 1.0, %v1359_v20 }
0x1106   :  { %1360 = vrcp.f32 %v870_v21 }
0x1113   :  { %v1361_v22 = vpop.eup %1360 }
0x1114   :  { %v874_v25 = vmul.f32 %v1361_v22, %v783_v56 }
0x1174   :  { %v877_v23 = vpop.permute.xlu0 %876 }
0x1175   :  { %v879_v24 = vmul.f32 %v1361_v22, %v877_v23 }
0x1177   :  { %881 = vrot.lane.b32.xlu1 %v879_v24, %s1401_s3 }
0x11e9   :  { %v882_v26 = vpop.permute.xlu1 %881 }
0x11ea   :  { %v884_v59 = vadd.f32 %v882_v26, %v874_v25 }
0x11ec   :  { %1362 = vtanh.f32 %v884_v59 }
0x11f9   :  { %v1363_v27 = vpop.eup %1362 }
0x11fa   :  { %887 = vrot.lane.b32.xlu0 %v1363_v27, %s1400_s17 }
0x126c   :  { %v888_v28 = vpop.permute.xlu0 %887 }
0x126d   :  { %v890_v29 = vmul.f32 %v1361_v22, %v888_v28 }
0x126f   :  { %893 = vrot.lane.b32.xlu1 %v890_v29, %s1401_s3 }
0x12e1   :  { %v894_v30 = vpop.permute.xlu1 %893 }
0x12e2   :  { %1290 = vmatmul.mubr.msk.f32.vlgmr.msra.gmra.mxu1 %vm186_vm2, %v894_v30 }
0x13a2   :  { %v963_v32 = vpop.f32.mrf.mxu1 }
0x13a3   :  { %v967_v33 = vadd.f32 %v963_v32, %v170_v31 }
0x13a4   :  { %v1291_v34 = vpop.f32.mrf.mxu1 }
0x13a5   :  { %1364 = vtanh.f32 %v967_v33  ;;  %v1129_v36 = vmul.f32 -1.442695, %v967_v33 }
0x13a7   :  { %1366 = vpow2.f32 %v1129_v36 }
0x13b2   :  { %v1365_v35 = vpop.eup %1364 }
0x13b3   :  { %977 = vrot.lane.b32.xlu0 %v1365_v35, %s1400_s17 }
0x13b4   :  { %v1367_v37 = vpop.eup %1366 }
0x13b5   :  { %v971_v38 = vadd.f32 1.0, %v1367_v37 }
0x13b7   :  { %1368 = vrcp.f32 %v971_v38 }
0x13c4   :  { %v1369_v39 = vpop.eup %1368 }
0x13c5   :  { %v975_v42 = vmul.f32 %v1369_v39, %v884_v59 }
0x1425   :  { %v978_v40 = vpop.permute.xlu0 %977 }
0x1426   :  { %v980_v41 = vmul.f32 %v1369_v39, %v978_v40 }
0x1428   :  { %982 = vrot.lane.b32.xlu1 %v980_v41, %s1401_s3 }
0x149a   :  { %v983_v43 = vpop.permute.xlu1 %982 }
0x149b   :  { %v985_v10 = vadd.f32 %v983_v43, %v975_v42 }
0x149d   :  { %1370 = vtanh.f32 %v985_v10 }
0x14aa   :  { %v1371_v47 = vpop.eup %1370 }
0x14ab   :  { %988 = vrot.lane.b32.xlu0 %v1371_v47, %s1400_s17 }
0x151d   :  { %v989_v48 = vpop.permute.xlu0 %988 }
0x151e   :  { %v991_v49 = vmul.f32 %v1369_v39, %v989_v48 }
0x1520   :  { %993 = vrot.lane.b32.xlu1 %v991_v49, %s1401_s3 }
0x1592   :  { %v994_v50 = vpop.permute.xlu1 %993 }
0x1593   :  { %996 = vst.msk [vmem:[#allocation3] sm:$0xff] %vm186_vm2, %v994_v50  ;;  %1301 = vmatmul.mubr.msk.f32.vlgmr.msra.gmra.mxu0 %vm186_vm2, %v994_v50 }
0x1594   :  { %1387 = shalt.err (!%p1384_p4)
}
0x1595   :  { %1099 = dma.vmem_to_hbm [thread:$0]  %s1097_s14, 128, %s1682_s7, [#allocation4]   ;;  %v1130_v3 = vld [vmem:[%s1680_s5] ss:$0 sm:$0xff]  ;;  %vm1086_vm3 = vcmask 23552  }
0x1653   :  { %v1076_v51 = vpop.f32.mrf.mxu0 }
0x1654   :  { %v1077_v52 = vadd.f32 %v1130_v3, %v1076_v51 }
0x1655   :  { %v1302_v53 = vpop.f32.mrf.mxu0 }
0x1656   :  { %v1132_v54 = vmul.f32 -1.442695, %v1077_v52 }
0x1658   :  { %1372 = vpow2.f32 %v1132_v54 }
0x1665   :  { %v1373_v55 = vpop.eup %1372 }
0x1666   :  { %v1083_v57 = vadd.f32 1.0, %v1373_v55 }
0x1668   :  { %1374 = vrcp.f32 %v1083_v57 }
0x1675   :  { %v1375_v60 = vpop.eup %1374 }
0x1676   :  { %1087 = vst.msk [vmem:[%s1681_s6] sm:$0xff] %vm1086_vm3, %v1375_v60 }
0x1677   :  { %1396 = dma.done.wait [#allocation4], 128  }
0x1678   :  { %1397 = vsyncadd [#allocation4], 4294967168 }
0x1679   :  { %1105 = vsyncpa [#allocation4], 1 }

</bundles_post_ra>
